<compile_context>
chip_gen: v7x
topology: tpu7x:2x2x1
jax: 0.10.0
libtpu: 0.0.40
codegen_flags: <defaults>
</compile_context>

<pallas_src>
import functools

import jax
import jax.numpy as jnp
from jax.experimental import pallas as pl
from jax.experimental.pallas import tpu as pltpu


def _sru_gate_kernel(feedback, chunk, wfc_ref, state_ref, f_ref, u_ref,
                     out_ref, cfin_ref, c_scr):
    t = pl.program_id(1)

    # (Re-)initialize the carried cell state at the start of each batch tile's
    # time loop.
    @pl.when(t == 0)
    def _():
        c_scr[...] = state_ref[...].astype(jnp.float32)

    # Hoist W_fc out of the unrolled timestep loop (JAX does not CSE broadcasts).
    wfc = wfc_ref[...]  # (1, D), broadcasts against (b_blk, D)

    c = c_scr[...]  # (b_blk, D) float32 carry
    for i in range(chunk):  # static unroll over the time chunk
        f_i = f_ref[:, i, :].astype(jnp.float32)
        u_i = u_ref[:, i, :].astype(jnp.float32)
        if feedback:
            g = jax.nn.sigmoid(f_i + wfc * c)
        else:
            g = jax.nn.sigmoid(f_i)  # fused here; no wrapper-level sigmoid pass
        c = (1.0 - g) * c + g * u_i
        out_ref[:, i, :] = c.astype(out_ref.dtype)

    c_scr[...] = c  # carry across time chunks

    @pl.when(t == pl.num_programs(1) - 1)
    def _():
        cfin_ref[...] = c.astype(cfin_ref.dtype)


def _pick_chunk(L, max_chunk):
    """Largest time-chunk that satisfies the (8,128) block constraint."""
    if L <= max_chunk:
        return L  # block covers the full L axis (always legal)
    best = None
    for c in range(8, max_chunk + 1, 8):  # multiples of 8 that divide L
        if L % c == 0:
            best = c
    return best if best is not None else L


def sru_rnn_gate(f, u, w_fc=None, state=None, *, feedback=True, max_chunk=64):
    """f, u: (batch, length, dim). Returns ((batch, length, dim), (batch, dim))."""
    B, L, D = f.shape
    assert u.shape == (B, L, D)
    out_dtype = f.dtype

    if feedback:
        assert w_fc is not None and w_fc.shape == (D,)
        wfc2 = w_fc.astype(jnp.float32).reshape(1, D)
    else:
        wfc2 = jnp.zeros((1, D), jnp.float32)  # unused inside kernel

    if state is None:
        state = jnp.zeros((B, D), jnp.float32)
    else:
        assert state.shape == (B, D)

    chunk = _pick_chunk(L, max_chunk)
    assert L % chunk == 0
    nt = L // chunk

    # Batch tiling (parallel axis). Keep full B when it can't be tiled legally.
    if B > 8 and B % 8 == 0:
        b_blk = 8
    else:
        b_blk = B
    nb = B // b_blk

    kernel = functools.partial(_sru_gate_kernel, feedback, chunk)

    # TODO(synk): blocks stay narrow in the lane dim when D < 128 (masked stores);
    # padding D or folding B into lanes would add an extra HBM pass for small D.
    out, c_fin = pl.pallas_call(
        kernel,
        out_shape=(
            jax.ShapeDtypeStruct((B, L, D), out_dtype),
            jax.ShapeDtypeStruct((B, D), out_dtype),
        ),
        grid_spec=pltpu.PrefetchScalarGridSpec(
            num_scalar_prefetch=0,
            grid=(nb, nt),
            in_specs=[
                pl.BlockSpec((1, D), lambda b, t: (0, 0)),               # W_fc
                pl.BlockSpec((b_blk, D), lambda b, t: (b, 0)),           # init state
                pl.BlockSpec((b_blk, chunk, D), lambda b, t: (b, t, 0)),  # f chunk
                pl.BlockSpec((b_blk, chunk, D), lambda b, t: (b, t, 0)),  # u chunk
            ],
            out_specs=[
                pl.BlockSpec((b_blk, chunk, D), lambda b, t: (b, t, 0)),  # c_t stack
                pl.BlockSpec((b_blk, D), lambda b, t: (b, 0)),            # final c
            ],
            scratch_shapes=[pltpu.VMEM((b_blk, D), jnp.float32)],  # carried c (f32)
        ),
        compiler_params=pltpu.CompilerParams(
            dimension_semantics=("parallel", "arbitrary"),  # time is sequential
        ),
    )(wfc2, state, f, u)

    return out, c_fin


def _reference(f, u, w_fc, state, feedback=True):
    """Pure-JAX reference (mirrors the PyTorch loop)."""
    if not feedback:
        f = jax.nn.sigmoid(f)

    def step(c, fu):
        f_, u_ = fu
        if feedback:
            f_ = jax.nn.sigmoid(f_ + w_fc * c)
        c_new = (1.0 - f_) * c + f_ * u_
        return c_new, c_new

    f_t = jnp.transpose(f, (1, 0, 2))
    u_t = jnp.transpose(u, (1, 0, 2))
    c_fin, cs = jax.lax.scan(step, state, (f_t, u_t))
    return jnp.transpose(cs, (1, 0, 2)), c_fin


if __name__ == "__main__":
    key = jax.random.PRNGKey(0)
    B, L, D = 2, 8, 32  # batch, length, d_model

    k1, k2, k3, k4 = jax.random.split(key, 4)
    f = jax.random.normal(k1, (B, L, D), jnp.float32)
    u = jax.random.normal(k2, (B, L, D), jnp.float32)
    w_fc = jax.random.normal(k3, (D,), jnp.float32)  # W_fc ~ randn(d_model)
    state0 = jnp.zeros((B, D), jnp.float32)

    # feedback=True, zero initial state (single time chunk).
    out, c_fin = sru_rnn_gate(f, u, w_fc, state=None, feedback=True)
    out = jax.block_until_ready(out)
    c_fin = jax.block_until_ready(c_fin)
    ref_out, ref_c = _reference(f, u, w_fc, state0, feedback=True)
    assert out.shape == (B, L, D) and c_fin.shape == (B, D)
    assert jnp.allclose(out, ref_out, atol=1e-5, rtol=1e-5)
    assert jnp.allclose(c_fin, ref_c, atol=1e-5, rtol=1e-5)

    # feedback=False (QRNN-reduce path; sigmoid fused into the kernel).
    out_nf, c_nf = sru_rnn_gate(f, u, None, state=None, feedback=False)
    ref_out_nf, ref_c_nf = _reference(f, u, None, state0, feedback=False)
    assert jnp.allclose(jax.block_until_ready(out_nf), ref_out_nf, atol=1e-5, rtol=1e-5)
    assert jnp.allclose(jax.block_until_ready(c_nf), ref_c_nf, atol=1e-5, rtol=1e-5)

    # Multi-chunk time axis + nonzero initial state (exercises the carried scratch
    # across grid steps and the state-init path).
    L2 = 64
    k5, k6 = jax.random.split(k4)
    f2 = jax.random.normal(k5, (B, L2, D), jnp.float32)
    u2 = jax.random.normal(k6, (B, L2, D), jnp.float32)
    state1 = jax.random.normal(k4, (B, D), jnp.float32)
    out2, c2 = sru_rnn_gate(f2, u2, w_fc, state=state1, feedback=True, max_chunk=16)
    ref_out2, ref_c2 = _reference(f2, u2, w_fc, state1, feedback=True)
    assert jnp.allclose(jax.block_until_ready(out2), ref_out2, atol=1e-5, rtol=1e-5)
    assert jnp.allclose(jax.block_until_ready(c2), ref_c2, atol=1e-5, rtol=1e-5)

    print("KERNEL_OK")
</pallas_src>

<mosaic_0001>
module attributes {stable_mosaic.version = 11 : i64} {
  func.func @_sru_gate_kernel(%arg0: i32, %arg1: i32, %arg2: memref<1x32xf32, #tpu.memory_space<vmem>>, %arg3: memref<2x32xf32, #tpu.memory_space<vmem>>, %arg4: memref<2x8x32xf32, #tpu.memory_space<vmem>>, %arg5: memref<2x8x32xf32, #tpu.memory_space<vmem>>, %arg6: memref<2x8x32xf32, #tpu.memory_space<vmem>>, %arg7: memref<2x32xf32, #tpu.memory_space<vmem>>, %arg8: memref<2x32xf32, #tpu.memory_space<vmem>>) attributes {dimension_semantics = [#tpu.dimension_semantics<parallel>, #tpu.dimension_semantics<arbitrary>], iteration_bounds = array<i64: 1, 1>, scalar_prefetch = 0 : i64, scratch_operands = 1 : i64, tpu.core_type = #tpu.core_type<tc>, window_params = [{pipeline_mode = #tpu.pipeline_mode<synchronous>, transform_indices = @transform_0, window_bounds = array<i64: 1, 32>}, {transform_indices = @transform_1, window_bounds = array<i64: 2, 32>}, {transform_indices = @transform_2, window_bounds = array<i64: 2, 8, 32>}, {transform_indices = @transform_3, window_bounds = array<i64: 2, 8, 32>}, {transform_indices = @transform_4, window_bounds = array<i64: 2, 8, 32>}, {transform_indices = @transform_5, window_bounds = array<i64: 2, 32>}]} {
    %c0_i32 = arith.constant 0 : i32
    %0 = arith.cmpi eq, %arg1, %c0_i32 : i32
    %1 = arith.extui %0 : i1 to i32
    %c0_i32_0 = arith.constant 0 : i32
    %2 = arith.cmpi ne, %1, %c0_i32_0 : i32
    scf.if %2 {
      %c0_88 = arith.constant 0 : index
      %c0_89 = arith.constant 0 : index
      %169 = vector.load %arg3[%c0_88, %c0_89] : memref<2x32xf32, #tpu.memory_space<vmem>>, vector<2x32xf32>
      %c0_90 = arith.constant 0 : index
      %c0_91 = arith.constant 0 : index
      %170 = vector.load %arg8[%c0_90, %c0_91] : memref<2x32xf32, #tpu.memory_space<vmem>>, vector<2x32xf32>
      tpu.vector_store %arg8[%c0_90, %c0_91], %169 {strides = array<i32>} : memref<2x32xf32, #tpu.memory_space<vmem>>, vector<2x32xf32>,
    } else {
    }
    %c0 = arith.constant 0 : index
    %c0_1 = arith.constant 0 : index
    %3 = vector.load %arg2[%c0, %c0_1] : memref<1x32xf32, #tpu.memory_space<vmem>>, vector<1x32xf32>
    %c0_2 = arith.constant 0 : index
    %c0_3 = arith.constant 0 : index
    %4 = vector.load %arg8[%c0_2, %c0_3] : memref<2x32xf32, #tpu.memory_space<vmem>>, vector<2x32xf32>
    %c0_4 = arith.constant 0 : index
    %c0_5 = arith.constant 0 : index
    %c0_6 = arith.constant 0 : index
    %5 = vector.load %arg4[%c0_4, %c0_5, %c0_6] : memref<2x8x32xf32, #tpu.memory_space<vmem>>, vector<2x1x32xf32>
    %6 = vector.shape_cast %5 : vector<2x1x32xf32> to vector<2x32xf32>
    %c0_7 = arith.constant 0 : index
    %c0_8 = arith.constant 0 : index
    %c0_9 = arith.constant 0 : index
    %7 = vector.load %arg5[%c0_7, %c0_8, %c0_9] : memref<2x8x32xf32, #tpu.memory_space<vmem>>, vector<2x1x32xf32>
    %8 = vector.shape_cast %7 : vector<2x1x32xf32> to vector<2x32xf32>
    %9 = vector.broadcast %3 : vector<1x32xf32> to vector<2x32xf32>
    %10 = arith.mulf %9, %4 : vector<2x32xf32>
    %11 = arith.addf %6, %10 : vector<2x32xf32>
    %12 = arith.negf %11 : vector<2x32xf32>
    %13 = math.exp %12 : vector<2x32xf32>
    %cst = arith.constant 1.000000e+00 : f32
    %14 = vector.broadcast %cst : f32 to vector<2x32xf32>
    %15 = arith.addf %14, %13 : vector<2x32xf32>
    %16 = arith.divf %14, %15 : vector<2x32xf32>
    %cst_10 = arith.constant 1.000000e+00 : f32
    %17 = vector.broadcast %cst_10 : f32 to vector<2x32xf32>
    %18 = arith.subf %17, %16 : vector<2x32xf32>
    %19 = arith.mulf %18, %4 : vector<2x32xf32>
    %20 = arith.mulf %16, %8 : vector<2x32xf32>
    %21 = arith.addf %19, %20 : vector<2x32xf32>
    %c0_11 = arith.constant 0 : index
    %c0_12 = arith.constant 0 : index
    %c0_13 = arith.constant 0 : index
    %22 = vector.load %arg6[%c0_11, %c0_12, %c0_13] : memref<2x8x32xf32, #tpu.memory_space<vmem>>, vector<2x1x32xf32>
    %23 = vector.shape_cast %22 : vector<2x1x32xf32> to vector<2x32xf32>
    %24 = vector.shape_cast %21 : vector<2x32xf32> to vector<2x1x32xf32>
    tpu.vector_store %arg6[%c0_11, %c0_12, %c0_13], %24 {strides = array<i32>} : memref<2x8x32xf32, #tpu.memory_space<vmem>>, vector<2x1x32xf32>,
    %c0_14 = arith.constant 0 : index
    %c1 = arith.constant 1 : index
    %c0_15 = arith.constant 0 : index
    %25 = vector.load %arg4[%c0_14, %c1, %c0_15] : memref<2x8x32xf32, #tpu.memory_space<vmem>>, vector<2x1x32xf32>
    %26 = vector.shape_cast %25 : vector<2x1x32xf32> to vector<2x32xf32>
    %c0_16 = arith.constant 0 : index
    %c1_17 = arith.constant 1 : index
    %c0_18 = arith.constant 0 : index
    %27 = vector.load %arg5[%c0_16, %c1_17, %c0_18] : memref<2x8x32xf32, #tpu.memory_space<vmem>>, vector<2x1x32xf32>
    %28 = vector.shape_cast %27 : vector<2x1x32xf32> to vector<2x32xf32>
    %29 = vector.broadcast %3 : vector<1x32xf32> to vector<2x32xf32>
    %30 = arith.mulf %29, %21 : vector<2x32xf32>
    %31 = arith.addf %26, %30 : vector<2x32xf32>
    %32 = arith.negf %31 : vector<2x32xf32>
    %33 = math.exp %32 : vector<2x32xf32>
    %cst_19 = arith.constant 1.000000e+00 : f32
    %34 = vector.broadcast %cst_19 : f32 to vector<2x32xf32>
    %35 = arith.addf %34, %33 : vector<2x32xf32>
    %36 = arith.divf %34, %35 : vector<2x32xf32>
    %cst_20 = arith.constant 1.000000e+00 : f32
    %37 = vector.broadcast %cst_20 : f32 to vector<2x32xf32>
    %38 = arith.subf %37, %36 : vector<2x32xf32>
    %39 = arith.mulf %38, %21 : vector<2x32xf32>
    %40 = arith.mulf %36, %28 : vector<2x32xf32>
    %41 = arith.addf %39, %40 : vector<2x32xf32>
    %c0_21 = arith.constant 0 : index
    %c1_22 = arith.constant 1 : index
    %c0_23 = arith.constant 0 : index
    %42 = vector.load %arg6[%c0_21, %c1_22, %c0_23] : memref<2x8x32xf32, #tpu.memory_space<vmem>>, vector<2x1x32xf32>
    %43 = vector.shape_cast %42 : vector<2x1x32xf32> to vector<2x32xf32>
    %44 = vector.shape_cast %41 : vector<2x32xf32> to vector<2x1x32xf32>
    tpu.vector_store %arg6[%c0_21, %c1_22, %c0_23], %44 {strides = array<i32>} : memref<2x8x32xf32, #tpu.memory_space<vmem>>, vector<2x1x32xf32>,
    %c0_24 = arith.constant 0 : index
    %c2 = arith.constant 2 : index
    %c0_25 = arith.constant 0 : index
    %45 = vector.load %arg4[%c0_24, %c2, %c0_25] : memref<2x8x32xf32, #tpu.memory_space<vmem>>, vector<2x1x32xf32>
    %46 = vector.shape_cast %45 : vector<2x1x32xf32> to vector<2x32xf32>
    %c0_26 = arith.constant 0 : index
    %c2_27 = arith.constant 2 : index
    %c0_28 = arith.constant 0 : index
    %47 = vector.load %arg5[%c0_26, %c2_27, %c0_28] : memref<2x8x32xf32, #tpu.memory_space<vmem>>, vector<2x1x32xf32>
    %48 = vector.shape_cast %47 : vector<2x1x32xf32> to vector<2x32xf32>
    %49 = vector.broadcast %3 : vector<1x32xf32> to vector<2x32xf32>
    %50 = arith.mulf %49, %41 : vector<2x32xf32>
    %51 = arith.addf %46, %50 : vector<2x32xf32>
    %52 = arith.negf %51 : vector<2x32xf32>
    %53 = math.exp %52 : vector<2x32xf32>
    %cst_29 = arith.constant 1.000000e+00 : f32
    %54 = vector.broadcast %cst_29 : f32 to vector<2x32xf32>
    %55 = arith.addf %54, %53 : vector<2x32xf32>
    %56 = arith.divf %54, %55 : vector<2x32xf32>
    %cst_30 = arith.constant 1.000000e+00 : f32
    %57 = vector.broadcast %cst_30 : f32 to vector<2x32xf32>
    %58 = arith.subf %57, %56 : vector<2x32xf32>
    %59 = arith.mulf %58, %41 : vector<2x32xf32>
    %60 = arith.mulf %56, %48 : vector<2x32xf32>
    %61 = arith.addf %59, %60 : vector<2x32xf32>
    %c0_31 = arith.constant 0 : index
    %c2_32 = arith.constant 2 : index
    %c0_33 = arith.constant 0 : index
    %62 = vector.load %arg6[%c0_31, %c2_32, %c0_33] : memref<2x8x32xf32, #tpu.memory_space<vmem>>, vector<2x1x32xf32>
    %63 = vector.shape_cast %62 : vector<2x1x32xf32> to vector<2x32xf32>
    %64 = vector.shape_cast %61 : vector<2x32xf32> to vector<2x1x32xf32>
    tpu.vector_store %arg6[%c0_31, %c2_32, %c0_33], %64 {strides = array<i32>} : memref<2x8x32xf32, #tpu.memory_space<vmem>>, vector<2x1x32xf32>,
    %c0_34 = arith.constant 0 : index
    %c3 = arith.constant 3 : index
    %c0_35 = arith.constant 0 : index
    %65 = vector.load %arg4[%c0_34, %c3, %c0_35] : memref<2x8x32xf32, #tpu.memory_space<vmem>>, vector<2x1x32xf32>
    %66 = vector.shape_cast %65 : vector<2x1x32xf32> to vector<2x32xf32>
    %c0_36 = arith.constant 0 : index
    %c3_37 = arith.constant 3 : index
    %c0_38 = arith.constant 0 : index
    %67 = vector.load %arg5[%c0_36, %c3_37, %c0_38] : memref<2x8x32xf32, #tpu.memory_space<vmem>>, vector<2x1x32xf32>
    %68 = vector.shape_cast %67 : vector<2x1x32xf32> to vector<2x32xf32>
    %69 = vector.broadcast %3 : vector<1x32xf32> to vector<2x32xf32>
    %70 = arith.mulf %69, %61 : vector<2x32xf32>
    %71 = arith.addf %66, %70 : vector<2x32xf32>
    %72 = arith.negf %71 : vector<2x32xf32>
    %73 = math.exp %72 : vector<2x32xf32>
    %cst_39 = arith.constant 1.000000e+00 : f32
    %74 = vector.broadcast %cst_39 : f32 to vector<2x32xf32>
    %75 = arith.addf %74, %73 : vector<2x32xf32>
    %76 = arith.divf %74, %75 : vector<2x32xf32>
    %cst_40 = arith.constant 1.000000e+00 : f32
    %77 = vector.broadcast %cst_40 : f32 to vector<2x32xf32>
    %78 = arith.subf %77, %76 : vector<2x32xf32>
    %79 = arith.mulf %78, %61 : vector<2x32xf32>
    %80 = arith.mulf %76, %68 : vector<2x32xf32>
    %81 = arith.addf %79, %80 : vector<2x32xf32>
    %c0_41 = arith.constant 0 : index
    %c3_42 = arith.constant 3 : index
    %c0_43 = arith.constant 0 : index
    %82 = vector.load %arg6[%c0_41, %c3_42, %c0_43] : memref<2x8x32xf32, #tpu.memory_space<vmem>>, vector<2x1x32xf32>
    %83 = vector.shape_cast %82 : vector<2x1x32xf32> to vector<2x32xf32>
    %84 = vector.shape_cast %81 : vector<2x32xf32> to vector<2x1x32xf32>
    tpu.vector_store %arg6[%c0_41, %c3_42, %c0_43], %84 {strides = array<i32>} : memref<2x8x32xf32, #tpu.memory_space<vmem>>, vector<2x1x32xf32>,
    %c0_44 = arith.constant 0 : index
    %c4 = arith.constant 4 : index
    %c0_45 = arith.constant 0 : index
    %85 = vector.load %arg4[%c0_44, %c4, %c0_45] : memref<2x8x32xf32, #tpu.memory_space<vmem>>, vector<2x1x32xf32>
    %86 = vector.shape_cast %85 : vector<2x1x32xf32> to vector<2x32xf32>
    %c0_46 = arith.constant 0 : index
    %c4_47 = arith.constant 4 : index
    %c0_48 = arith.constant 0 : index
    %87 = vector.load %arg5[%c0_46, %c4_47, %c0_48] : memref<2x8x32xf32, #tpu.memory_space<vmem>>, vector<2x1x32xf32>
    %88 = vector.shape_cast %87 : vector<2x1x32xf32> to vector<2x32xf32>
    %89 = vector.broadcast %3 : vector<1x32xf32> to vector<2x32xf32>
    %90 = arith.mulf %89, %81 : vector<2x32xf32>
    %91 = arith.addf %86, %90 : vector<2x32xf32>
    %92 = arith.negf %91 : vector<2x32xf32>
    %93 = math.exp %92 : vector<2x32xf32>
    %cst_49 = arith.constant 1.000000e+00 : f32
    %94 = vector.broadcast %cst_49 : f32 to vector<2x32xf32>
    %95 = arith.addf %94, %93 : vector<2x32xf32>
    %96 = arith.divf %94, %95 : vector<2x32xf32>
    %cst_50 = arith.constant 1.000000e+00 : f32
    %97 = vector.broadcast %cst_50 : f32 to vector<2x32xf32>
    %98 = arith.subf %97, %96 : vector<2x32xf32>
    %99 = arith.mulf %98, %81 : vector<2x32xf32>
    %100 = arith.mulf %96, %88 : vector<2x32xf32>
    %101 = arith.addf %99, %100 : vector<2x32xf32>
    %c0_51 = arith.constant 0 : index
    %c4_52 = arith.constant 4 : index
    %c0_53 = arith.constant 0 : index
    %102 = vector.load %arg6[%c0_51, %c4_52, %c0_53] : memref<2x8x32xf32, #tpu.memory_space<vmem>>, vector<2x1x32xf32>
    %103 = vector.shape_cast %102 : vector<2x1x32xf32> to vector<2x32xf32>
    %104 = vector.shape_cast %101 : vector<2x32xf32> to vector<2x1x32xf32>
    tpu.vector_store %arg6[%c0_51, %c4_52, %c0_53], %104 {strides = array<i32>} : memref<2x8x32xf32, #tpu.memory_space<vmem>>, vector<2x1x32xf32>,
    %c0_54 = arith.constant 0 : index
    %c5 = arith.constant 5 : index
    %c0_55 = arith.constant 0 : index
    %105 = vector.load %arg4[%c0_54, %c5, %c0_55] : memref<2x8x32xf32, #tpu.memory_space<vmem>>, vector<2x1x32xf32>
    %106 = vector.shape_cast %105 : vector<2x1x32xf32> to vector<2x32xf32>
    %c0_56 = arith.constant 0 : index
    %c5_57 = arith.constant 5 : index
    %c0_58 = arith.constant 0 : index
    %107 = vector.load %arg5[%c0_56, %c5_57, %c0_58] : memref<2x8x32xf32, #tpu.memory_space<vmem>>, vector<2x1x32xf32>
    %108 = vector.shape_cast %107 : vector<2x1x32xf32> to vector<2x32xf32>
    %109 = vector.broadcast %3 : vector<1x32xf32> to vector<2x32xf32>
    %110 = arith.mulf %109, %101 : vector<2x32xf32>
    %111 = arith.addf %106, %110 : vector<2x32xf32>
    %112 = arith.negf %111 : vector<2x32xf32>
    %113 = math.exp %112 : vector<2x32xf32>
    %cst_59 = arith.constant 1.000000e+00 : f32
    %114 = vector.broadcast %cst_59 : f32 to vector<2x32xf32>
    %115 = arith.addf %114, %113 : vector<2x32xf32>
    %116 = arith.divf %114, %115 : vector<2x32xf32>
    %cst_60 = arith.constant 1.000000e+00 : f32
    %117 = vector.broadcast %cst_60 : f32 to vector<2x32xf32>
    %118 = arith.subf %117, %116 : vector<2x32xf32>
    %119 = arith.mulf %118, %101 : vector<2x32xf32>
    %120 = arith.mulf %116, %108 : vector<2x32xf32>
    %121 = arith.addf %119, %120 : vector<2x32xf32>
    %c0_61 = arith.constant 0 : index
    %c5_62 = arith.constant 5 : index
    %c0_63 = arith.constant 0 : index
    %122 = vector.load %arg6[%c0_61, %c5_62, %c0_63] : memref<2x8x32xf32, #tpu.memory_space<vmem>>, vector<2x1x32xf32>
    %123 = vector.shape_cast %122 : vector<2x1x32xf32> to vector<2x32xf32>
    %124 = vector.shape_cast %121 : vector<2x32xf32> to vector<2x1x32xf32>
    tpu.vector_store %arg6[%c0_61, %c5_62, %c0_63], %124 {strides = array<i32>} : memref<2x8x32xf32, #tpu.memory_space<vmem>>, vector<2x1x32xf32>,
    %c0_64 = arith.constant 0 : index
    %c6 = arith.constant 6 : index
    %c0_65 = arith.constant 0 : index
    %125 = vector.load %arg4[%c0_64, %c6, %c0_65] : memref<2x8x32xf32, #tpu.memory_space<vmem>>, vector<2x1x32xf32>
    %126 = vector.shape_cast %125 : vector<2x1x32xf32> to vector<2x32xf32>
    %c0_66 = arith.constant 0 : index
    %c6_67 = arith.constant 6 : index
    %c0_68 = arith.constant 0 : index
    %127 = vector.load %arg5[%c0_66, %c6_67, %c0_68] : memref<2x8x32xf32, #tpu.memory_space<vmem>>, vector<2x1x32xf32>
    %128 = vector.shape_cast %127 : vector<2x1x32xf32> to vector<2x32xf32>
    %129 = vector.broadcast %3 : vector<1x32xf32> to vector<2x32xf32>
    %130 = arith.mulf %129, %121 : vector<2x32xf32>
    %131 = arith.addf %126, %130 : vector<2x32xf32>
    %132 = arith.negf %131 : vector<2x32xf32>
    %133 = math.exp %132 : vector<2x32xf32>
    %cst_69 = arith.constant 1.000000e+00 : f32
    %134 = vector.broadcast %cst_69 : f32 to vector<2x32xf32>
    %135 = arith.addf %134, %133 : vector<2x32xf32>
    %136 = arith.divf %134, %135 : vector<2x32xf32>
    %cst_70 = arith.constant 1.000000e+00 : f32
    %137 = vector.broadcast %cst_70 : f32 to vector<2x32xf32>
    %138 = arith.subf %137, %136 : vector<2x32xf32>
    %139 = arith.mulf %138, %121 : vector<2x32xf32>
    %140 = arith.mulf %136, %128 : vector<2x32xf32>
    %141 = arith.addf %139, %140 : vector<2x32xf32>
    %c0_71 = arith.constant 0 : index
    %c6_72 = arith.constant 6 : index
    %c0_73 = arith.constant 0 : index
    %142 = vector.load %arg6[%c0_71, %c6_72, %c0_73] : memref<2x8x32xf32, #tpu.memory_space<vmem>>, vector<2x1x32xf32>
    %143 = vector.shape_cast %142 : vector<2x1x32xf32> to vector<2x32xf32>
    %144 = vector.shape_cast %141 : vector<2x32xf32> to vector<2x1x32xf32>
    tpu.vector_store %arg6[%c0_71, %c6_72, %c0_73], %144 {strides = array<i32>} : memref<2x8x32xf32, #tpu.memory_space<vmem>>, vector<2x1x32xf32>,
    %c0_74 = arith.constant 0 : index
    %c7 = arith.constant 7 : index
    %c0_75 = arith.constant 0 : index
    %145 = vector.load %arg4[%c0_74, %c7, %c0_75] : memref<2x8x32xf32, #tpu.memory_space<vmem>>, vector<2x1x32xf32>
    %146 = vector.shape_cast %145 : vector<2x1x32xf32> to vector<2x32xf32>
    %c0_76 = arith.constant 0 : index
    %c7_77 = arith.constant 7 : index
    %c0_78 = arith.constant 0 : index
    %147 = vector.load %arg5[%c0_76, %c7_77, %c0_78] : memref<2x8x32xf32, #tpu.memory_space<vmem>>, vector<2x1x32xf32>
    %148 = vector.shape_cast %147 : vector<2x1x32xf32> to vector<2x32xf32>
    %149 = vector.broadcast %3 : vector<1x32xf32> to vector<2x32xf32>
    %150 = arith.mulf %149, %141 : vector<2x32xf32>
    %151 = arith.addf %146, %150 : vector<2x32xf32>
    %152 = arith.negf %151 : vector<2x32xf32>
    %153 = math.exp %152 : vector<2x32xf32>
    %cst_79 = arith.constant 1.000000e+00 : f32
    %154 = vector.broadcast %cst_79 : f32 to vector<2x32xf32>
    %155 = arith.addf %154, %153 : vector<2x32xf32>
    %156 = arith.divf %154, %155 : vector<2x32xf32>
    %cst_80 = arith.constant 1.000000e+00 : f32
    %157 = vector.broadcast %cst_80 : f32 to vector<2x32xf32>
    %158 = arith.subf %157, %156 : vector<2x32xf32>
    %159 = arith.mulf %158, %141 : vector<2x32xf32>
    %160 = arith.mulf %156, %148 : vector<2x32xf32>
    %161 = arith.addf %159, %160 : vector<2x32xf32>
    %c0_81 = arith.constant 0 : index
    %c7_82 = arith.constant 7 : index
    %c0_83 = arith.constant 0 : index
    %162 = vector.load %arg6[%c0_81, %c7_82, %c0_83] : memref<2x8x32xf32, #tpu.memory_space<vmem>>, vector<2x1x32xf32>
    %163 = vector.shape_cast %162 : vector<2x1x32xf32> to vector<2x32xf32>
    %164 = vector.shape_cast %161 : vector<2x32xf32> to vector<2x1x32xf32>
    tpu.vector_store %arg6[%c0_81, %c7_82, %c0_83], %164 {strides = array<i32>} : memref<2x8x32xf32, #tpu.memory_space<vmem>>, vector<2x1x32xf32>,
    %c0_84 = arith.constant 0 : index
    %c0_85 = arith.constant 0 : index
    %165 = vector.load %arg8[%c0_84, %c0_85] : memref<2x32xf32, #tpu.memory_space<vmem>>, vector<2x32xf32>
    tpu.vector_store %arg8[%c0_84, %c0_85], %161 {strides = array<i32>} : memref<2x32xf32, #tpu.memory_space<vmem>>, vector<2x32xf32>,
    %c0_i32_86 = arith.constant 0 : i32
    %166 = arith.cmpi eq, %arg1, %c0_i32_86 : i32
    %167 = arith.extui %166 : i1 to i32
    %c0_i32_87 = arith.constant 0 : i32
    %168 = arith.cmpi ne, %167, %c0_i32_87 : i32
    scf.if %168 {
      %c0_88 = arith.constant 0 : index
      %c0_89 = arith.constant 0 : index
      %169 = vector.load %arg7[%c0_88, %c0_89] : memref<2x32xf32, #tpu.memory_space<vmem>>, vector<2x32xf32>
      tpu.vector_store %arg7[%c0_88, %c0_89], %161 {strides = array<i32>} : memref<2x32xf32, #tpu.memory_space<vmem>>, vector<2x32xf32>,
    } else {
    }
    return
  }
  func.func @transform_0(%arg0: i32, %arg1: i32) -> (i32, i32) {
    %c0_i32 = arith.constant 0 : i32
    %c0_i32_0 = arith.constant 0 : i32
    %c0_i32_1 = arith.constant 0 : i32
    return %c0_i32, %c0_i32_0 : i32, i32
  }
  func.func @transform_1(%arg0: i32, %arg1: i32) -> (i32, i32) {
    %c0_i32 = arith.constant 0 : i32
    %c0_i32_0 = arith.constant 0 : i32
    return %arg0, %c0_i32 : i32, i32
  }
  func.func @transform_2(%arg0: i32, %arg1: i32) -> (i32, i32, i32) {
    %c0_i32 = arith.constant 0 : i32
    %c0_i32_0 = arith.constant 0 : i32
    return %arg0, %arg1, %c0_i32 : i32, i32, i32
  }
  func.func @transform_3(%arg0: i32, %arg1: i32) -> (i32, i32, i32) {
    %c0_i32 = arith.constant 0 : i32
    %c0_i32_0 = arith.constant 0 : i32
    return %arg0, %arg1, %c0_i32 : i32, i32, i32
  }
  func.func @transform_4(%arg0: i32, %arg1: i32) -> (i32, i32, i32) {
    %c0_i32 = arith.constant 0 : i32
    %c0_i32_0 = arith.constant 0 : i32
    return %arg0, %arg1, %c0_i32 : i32, i32, i32
  }
  func.func @transform_5(%arg0: i32, %arg1: i32) -> (i32, i32) {
    %c0_i32 = arith.constant 0 : i32
    %c0_i32_0 = arith.constant 0 : i32
    return %arg0, %c0_i32 : i32, i32
  }
}

</mosaic_0001>

<bundles_post_ra>
// kernel: tpu_custom_call.1
= control target key start
LH: loop header
LB: loop body
LE: loop exit
PB: predicated region body
PF: predicated region fallthrough
CT: control target
= control target key end

     0   :  { %11 = vsyncpa [#allocation4], 0  ;;  %s782_s0 = inlined_call_operand.hbm [shape: f32[1,32], index: 0, kind: input, shape index: {}]   ;;  %s783_s1 = inlined_call_operand.vmem [shape: f32[2,32], index: 1, kind: input, shape index: {}]   ;;  %s784_s2 = inlined_call_operand.hbm [shape: f32[2,8,32], index: 2, kind: input, shape index: {}]   ;;  %s785_s3 = inlined_call_operand.hbm [shape: f32[2,8,32], index: 3, kind: input, shape index: {}]   ;;  %s786_s4 = inlined_call_operand.hbm [shape: f32[2,8,32], index: 4, kind: output, shape index: {0}]   ;;  %s787_s5 = inlined_call_operand.hbm [shape: f32[2,32], index: 5, kind: output, shape index: {1}]  }
   0x1   :  { %12 = vsyncpa [#allocation7], 0 }
   0x2   :  { %13 = vsyncpa [#allocation5], 0 }
   0x3   :  { %14 = vsyncpa [#allocation11], 0  ;;  %s629_s18 = smov [#allocation6]   ;;  %s511_s22 = scalar_lea.hbm %s784_s2, 256 }
   0x4   :  { %s32_s19 = sshll.u32 %s629_s18, 4  ;;  %p512_p0 = scmp.ne.s32.totalorder %s784_s2, %s511_s22  ;;  %s33_s19 = int_to_ptr.vmem [resolvable:$true] %s32_s19 }
   0x5   :  { %p515_p1 = scmp.lt.u32.totalorder %s511_s22, %s784_s2 }
   0x7   :  { %p517_p2 = pnand %p515_p1, %p512_p0 }
   0x9   :  { %520 = shalt.err (!%p517_p2)
}
   0xa   :  { %s521_s27 = scalar_lea.vmem %s33_s19, 256  ;;  %p526_p4 = scmp.lt.s32.totalorder %s33_s19, %s33_s19 }
   0xb   :  { %p522_p3 = scmp.ne.s32.totalorder %s33_s19, %s521_s27  ;;  %p527_p5 = scmp.lt.s32.totalorder %s521_s27, %s521_s27 }
   0xd   :  { %p528_p6 = por %p527_p5, %p526_p4 }
   0xf   :  { %p529_p7 = pnand %p528_p6, %p522_p3 }
  0x11   :  { %532 = shalt.err (!%p529_p7)
}
  0x12   :  { %s630_s28 = smov 128   ;;  %s631_s29 = smov 8  }
  0x13   :  { %38 = dma.hbm_to_vmem [thread:$0]  %s784_s2, 256, %s33_s19, [#allocation7], %s630_s28, %s630_s28, %s631_s29  }
  0x14   :  { %s632_s7 = smov [#allocation3]   ;;  %s633_s9 = smov [#allocation8]  }
  0x15   :  { %s21_s8 = sshll.u32 %s632_s7, 4  ;;  %s44_s10 = sshll.u32 %s633_s9, 4  ;;  %s22_s8 = int_to_ptr.vmem [resolvable:$true] %s21_s8  ;;  %s45_s10 = int_to_ptr.vmem [resolvable:$true] %s44_s10 }
  0x16   :  { %s533_s13 = scalar_lea.hbm %s782_s0, 16 }
  0x17   :  { %p534_p8 = scmp.ne.s32.totalorder %s782_s0, %s533_s13  ;;  %p537_p9 = scmp.lt.u32.totalorder %s533_s13, %s782_s0 }
  0x19   :  { %p539_p10 = pnand %p537_p9, %p534_p8 }
  0x1b   :  { %542 = shalt.err (!%p539_p10)
}
  0x1c   :  { %s543_s2 = scalar_lea.vmem %s22_s8, 16  ;;  %s547_s18 = scalar_lea.vmem %s22_s8, 32 }
  0x1d   :  { %p544_p11 = scmp.ne.s32.totalorder %s22_s8, %s543_s2  ;;  %p548_p12 = scmp.lt.s32.totalorder %s22_s8, %s22_s8 }
  0x1e   :  { %p549_p13 = scmp.lt.s32.totalorder %s547_s18, %s543_s2 }
  0x20   :  { %p550_p0 = por %p549_p13, %p548_p12 }
  0x22   :  { %p551_p1 = pnand %p550_p0, %p544_p11 }
  0x24   :  { %554 = shalt.err (!%p551_p1)
}
  0x25   :  { %24 = dma.hbm_to_vmem [thread:$0]  %s782_s0, 16, %s22_s8, [#allocation4]  }
  0x26   :  { %s555_s23 = scalar_lea.hbm %s785_s3, 256 }
  0x27   :  { %p556_p2 = scmp.ne.s32.totalorder %s785_s3, %s555_s23  ;;  %p559_p3 = scmp.lt.u32.totalorder %s555_s23, %s785_s3 }
  0x29   :  { %p561_p4 = pnand %p559_p3, %p556_p2 }
  0x2b   :  { %564 = shalt.err (!%p561_p4)
}
  0x2c   :  { %s565_s30 = scalar_lea.vmem %s45_s10, 256  ;;  %p570_p6 = scmp.lt.s32.totalorder %s45_s10, %s45_s10 }
  0x2d   :  { %p566_p5 = scmp.ne.s32.totalorder %s45_s10, %s565_s30  ;;  %p571_p7 = scmp.lt.s32.totalorder %s565_s30, %s565_s30 }
  0x2f   :  { %p572_p8 = por %p571_p7, %p570_p6 }
  0x31   :  { %p573_p9 = pnand %p572_p8, %p566_p5 }
  0x33   :  { %576 = shalt.err (!%p573_p9)
}
  0x34   :  { %50 = dma.hbm_to_vmem [thread:$0]  %s785_s3, 256, %s45_s10, [#allocation7], %s630_s28, %s630_s28, %s631_s29  }
  0x35   :  { %621 = dma.done.wait [#allocation4], 16  }
  0x36   :  { %622 = vsyncadd [#allocation4], 4294967280 }
  0x37   :  { %623 = dma.done.wait [#allocation7], 512  }
  0x38   :  { %624 = vsyncadd [#allocation7], 4294966784  ;;  %vm65_vm0 = vcmask 254976   ;;  %v64_v0 = vld [vmem:[%s783_s1] sm:$0x3]  ;;  %vm110_vm1 = vcmask 253952  }
  0x39   :  { %66 = vst.msk [vmem:[#allocation2] sm:$0x3] %vm65_vm0, %v64_v0  ;;  %v712_v1 = vld [vmem:[#allocation3] ss:$0 sm:$0xff]  ;;  %v69_v3 = vld [vmem:[#allocation6] sm:$0x1] }
  0x3a   :  { %v70_v5 = vld [vmem:[#allocation6 + $0x8] sm:$0x1]  ;;  %v71_v16 = vld [vmem:[#allocation8] sm:$0x1]  ;;  %v72_v19 = vld [vmem:[#allocation8 + $0x8] sm:$0x1] }
  0x3b   :  { %vm120_vm2 = vcmask 1041409   ;;  %v113_v29 = vld [vmem:[#allocation6 + $0x1] sm:$0x1]  ;;  %v114_v32 = vld [vmem:[#allocation6 + $0x9] sm:$0x1]  ;;  %s634_s1 = smov [#allocation9]  }
  0x3c   :  { %v115_v43 = vld [vmem:[#allocation8 + $0x1] sm:$0x1]  ;;  %v116_v46 = vld [vmem:[#allocation8 + $0x9] sm:$0x1]  ;;  %v152_v55 = vld [vmem:[#allocation6 + $0x2] sm:$0x1] }
  0x3d   :  { %v153_v58 = vld [vmem:[#allocation6 + $0xa] sm:$0x1]  ;;  %s396_s3 = sshll.u32 %s634_s1, 4  ;;  %s635_s9 = smov [#allocation10]   ;;  %s397_s3 = int_to_ptr.vmem [resolvable:$true] %s396_s3 }
  0x3e   :  { %s409_s10 = sshll.u32 %s635_s9, 4  ;;  %s577_s11 = scalar_lea.vmem %s397_s3, 256  ;;  %s745_s10 = int_to_ptr.vmem [resolvable:$true] %s409_s10 }
  0x3f   :  { %p578_p10 = scmp.ne.s32.totalorder %s397_s3, %s577_s11  ;;  %p582_p11 = scmp.lt.s32.totalorder %s397_s3, %s397_s3 }
  0x40   :  { %v68_v2 = vld [vmem:[#allocation2] sm:$0x3]  ;;  %p583_p12 = scmp.lt.s32.totalorder %s577_s11, %s577_s11 }
  0x41   :  { %v79_v4 = vmul.f32 %v712_v1, %v68_v2  ;;  %v101_v23 = vrot.slane %v68_v2, 1 }
  0x42   :  { %p584_p13 = por %p583_p12, %p582_p11 }
  0x43   :  { %v81_v6 = vrot.slane %v79_v4, 1  ;;  %v84_v7 = vadd.f32 %v79_v4, %v69_v3 }
  0x44   :  { %p585_p0 = pnand %p584_p13, %p578_p10 }
  0x45   :  { %v85_v8 = vadd.f32 %v81_v6, %v70_v5  ;;  %v424_v9 = vmul.f32 -1.442695, %v84_v7  ;;  %v154_v6 = vld [vmem:[#allocation8 + $0x2] sm:$0x1] }
  0x47   :  { %447 = vpow2.f32 %v424_v9  ;;  %v425_v10 = vmul.f32 -1.442695, %v85_v8  ;;  %v155_v9 = vld [vmem:[#allocation8 + $0xa] sm:$0x1] }
  0x49   :  { %449 = vpow2.f32 %v425_v10 }
  0x51   :  { %v448_v11 = vpop.eup %447 }
  0x52   :  { %v92_v12 = vadd.f32 1.0, %v448_v11 }
  0x53   :  { %v450_v13 = vpop.eup %449 }
  0x54   :  { %451 = vrcp.f32 %v92_v12  ;;  %v93_v14 = vadd.f32 1.0, %v450_v13 }
  0x56   :  { %453 = vrcp.f32 %v93_v14 }
  0x5e   :  { %v452_v15 = vpop.eup %451 }
  0x5f   :  { %v98_v17 = vsub.f32 1.0, %v452_v15  ;;  %v106_v21 = vmul.f32 %v452_v15, %v71_v16 }
  0x60   :  { %v454_v18 = vpop.eup %453 }
  0x61   :  { %v104_v20 = vmul.f32 %v98_v17, %v68_v2  ;;  %v99_v22 = vsub.f32 1.0, %v454_v18  ;;  %v107_v26 = vmul.f32 %v454_v18, %v72_v19  ;;  %v190_v18 = vld [vmem:[#allocation6 + $0x3] sm:$0x1] }
  0x63   :  { %v108_v24 = vadd.f32 %v106_v21, %v104_v20  ;;  %v105_v25 = vmul.f32 %v101_v23, %v99_v22  ;;  %v191_v21 = vld [vmem:[#allocation6 + $0xb] sm:$0x1] }
  0x65   :  { %111 = vst.msk [vmem:[#allocation9] sm:$0x1] %vm110_vm1, %v108_v24  ;;  %v109_v27 = vadd.f32 %v107_v26, %v105_v25 }
  0x67   :  { %112 = vst.msk [vmem:[#allocation9 + $0x8] sm:$0x1] %vm110_vm1, %v109_v27  ;;  %v119_v28 = vrot.slane %v109_v27, 7 }
  0x69   :  { %v121_v30 = vsel %vm120_vm2, %v119_v28, %v108_v24 }
  0x6a   :  { %v123_v31 = vmul.f32 %v712_v1, %v121_v30 }
  0x6c   :  { %v125_v33 = vrot.slane %v123_v31, 1  ;;  %v128_v34 = vadd.f32 %v123_v31, %v113_v29 }
  0x6e   :  { %v129_v35 = vadd.f32 %v125_v33, %v114_v32  ;;  %v426_v36 = vmul.f32 -1.442695, %v128_v34  ;;  %v192_v32 = vld [vmem:[#allocation8 + $0x3] sm:$0x1] }
  0x70   :  { %455 = vpow2.f32 %v426_v36  ;;  %v427_v37 = vmul.f32 -1.442695, %v129_v35  ;;  %v193_v35 = vld [vmem:[#allocation8 + $0xb] sm:$0x1] }
  0x72   :  { %457 = vpow2.f32 %v427_v37 }
  0x7a   :  { %v456_v38 = vpop.eup %455 }
  0x7b   :  { %v136_v39 = vadd.f32 1.0, %v456_v38 }
  0x7c   :  { %v458_v40 = vpop.eup %457 }
  0x7d   :  { %459 = vrcp.f32 %v136_v39  ;;  %v137_v41 = vadd.f32 1.0, %v458_v40 }
  0x7f   :  { %461 = vrcp.f32 %v137_v41 }
  0x87   :  { %v460_v42 = vpop.eup %459 }
  0x88   :  { %v142_v44 = vsub.f32 1.0, %v460_v42  ;;  %v146_v48 = vmul.f32 %v460_v42, %v115_v43 }
  0x89   :  { %v462_v45 = vpop.eup %461 }
  0x8a   :  { %v144_v47 = vmul.f32 %v142_v44, %v108_v24  ;;  %v143_v49 = vsub.f32 1.0, %v462_v45  ;;  %v147_v52 = vmul.f32 %v462_v45, %v116_v46  ;;  %v228_v44 = vld [vmem:[#allocation6 + $0x4] sm:$0x1] }
  0x8c   :  { %v148_v50 = vadd.f32 %v146_v48, %v144_v47  ;;  %v145_v51 = vmul.f32 %v143_v49, %v109_v27  ;;  %v229_v47 = vld [vmem:[#allocation6 + $0xc] sm:$0x1] }
  0x8e   :  { %150 = vst.msk [vmem:[#allocation9 + $0x1] sm:$0x1] %vm110_vm1, %v148_v50  ;;  %v149_v53 = vadd.f32 %v147_v52, %v145_v51 }
  0x90   :  { %151 = vst.msk [vmem:[#allocation9 + $0x9] sm:$0x1] %vm110_vm1, %v149_v53  ;;  %v158_v54 = vrot.slane %v149_v53, 7 }
  0x92   :  { %v159_v56 = vsel %vm120_vm2, %v158_v54, %v148_v50 }
  0x93   :  { %v161_v57 = vmul.f32 %v712_v1, %v159_v56 }
  0x95   :  { %v163_v59 = vrot.slane %v161_v57, 1  ;;  %v166_v60 = vadd.f32 %v161_v57, %v152_v55 }
  0x97   :  { %v167_v61 = vadd.f32 %v163_v59, %v153_v58  ;;  %v428_v62 = vmul.f32 -1.442695, %v166_v60  ;;  %v230_v58 = vld [vmem:[#allocation8 + $0x4] sm:$0x1] }
  0x99   :  { %463 = vpow2.f32 %v428_v62  ;;  %v429_v63 = vmul.f32 -1.442695, %v167_v61  ;;  %v231_v61 = vld [vmem:[#allocation8 + $0xc] sm:$0x1] }
  0x9b   :  { %465 = vpow2.f32 %v429_v63 }
  0xa3   :  { %v464_v0 = vpop.eup %463 }
  0xa4   :  { %v174_v2 = vadd.f32 1.0, %v464_v0 }
  0xa5   :  { %v466_v3 = vpop.eup %465 }
  0xa6   :  { %467 = vrcp.f32 %v174_v2  ;;  %v175_v4 = vadd.f32 1.0, %v466_v3 }
  0xa8   :  { %469 = vrcp.f32 %v175_v4 }
  0xb0   :  { %v468_v5 = vpop.eup %467 }
  0xb1   :  { %v180_v7 = vsub.f32 1.0, %v468_v5  ;;  %v184_v11 = vmul.f32 %v468_v5, %v154_v6 }
  0xb2   :  { %v470_v8 = vpop.eup %469 }
  0xb3   :  { %v182_v10 = vmul.f32 %v180_v7, %v148_v50  ;;  %v181_v12 = vsub.f32 1.0, %v470_v8  ;;  %v185_v15 = vmul.f32 %v470_v8, %v155_v9  ;;  %v266_v7 = vld [vmem:[#allocation6 + $0x5] sm:$0x1] }
  0xb5   :  { %v186_v13 = vadd.f32 %v184_v11, %v182_v10  ;;  %v183_v14 = vmul.f32 %v181_v12, %v149_v53  ;;  %v267_v10 = vld [vmem:[#allocation6 + $0xd] sm:$0x1] }
  0xb7   :  { %188 = vst.msk [vmem:[#allocation9 + $0x2] sm:$0x1] %vm110_vm1, %v186_v13  ;;  %v187_v16 = vadd.f32 %v185_v15, %v183_v14 }
  0xb9   :  { %189 = vst.msk [vmem:[#allocation9 + $0xa] sm:$0x1] %vm110_vm1, %v187_v16  ;;  %v196_v17 = vrot.slane %v187_v16, 7 }
  0xbb   :  { %v197_v19 = vsel %vm120_vm2, %v196_v17, %v186_v13 }
  0xbc   :  { %v199_v20 = vmul.f32 %v712_v1, %v197_v19 }
  0xbe   :  { %v201_v22 = vrot.slane %v199_v20, 1  ;;  %v204_v23 = vadd.f32 %v199_v20, %v190_v18 }
  0xc0   :  { %v205_v24 = vadd.f32 %v201_v22, %v191_v21  ;;  %v430_v25 = vmul.f32 -1.442695, %v204_v23  ;;  %v268_v21 = vld [vmem:[#allocation8 + $0x5] sm:$0x1] }
  0xc2   :  { %471 = vpow2.f32 %v430_v25  ;;  %v431_v26 = vmul.f32 -1.442695, %v205_v24  ;;  %v269_v24 = vld [vmem:[#allocation8 + $0xd] sm:$0x1] }
  0xc4   :  { %473 = vpow2.f32 %v431_v26 }
  0xcc   :  { %v472_v27 = vpop.eup %471 }
  0xcd   :  { %v212_v28 = vadd.f32 1.0, %v472_v27 }
  0xce   :  { %v474_v29 = vpop.eup %473 }
  0xcf   :  { %475 = vrcp.f32 %v212_v28  ;;  %v213_v30 = vadd.f32 1.0, %v474_v29 }
  0xd1   :  { %477 = vrcp.f32 %v213_v30 }
  0xd9   :  { %v476_v31 = vpop.eup %475 }
  0xda   :  { %v218_v33 = vsub.f32 1.0, %v476_v31  ;;  %v222_v37 = vmul.f32 %v476_v31, %v192_v32 }
  0xdb   :  { %v478_v34 = vpop.eup %477 }
  0xdc   :  { %v220_v36 = vmul.f32 %v218_v33, %v186_v13  ;;  %v219_v38 = vsub.f32 1.0, %v478_v34  ;;  %v223_v41 = vmul.f32 %v478_v34, %v193_v35  ;;  %v304_v33 = vld [vmem:[#allocation6 + $0x6] sm:$0x1] }
  0xde   :  { %v224_v39 = vadd.f32 %v222_v37, %v220_v36  ;;  %v221_v40 = vmul.f32 %v219_v38, %v187_v16  ;;  %v305_v36 = vld [vmem:[#allocation6 + $0xe] sm:$0x1] }
  0xe0   :  { %226 = vst.msk [vmem:[#allocation9 + $0x3] sm:$0x1] %vm110_vm1, %v224_v39  ;;  %v225_v42 = vadd.f32 %v223_v41, %v221_v40 }
  0xe2   :  { %227 = vst.msk [vmem:[#allocation9 + $0xb] sm:$0x1] %vm110_vm1, %v225_v42  ;;  %v234_v43 = vrot.slane %v225_v42, 7 }
  0xe4   :  { %v235_v45 = vsel %vm120_vm2, %v234_v43, %v224_v39 }
  0xe5   :  { %v237_v46 = vmul.f32 %v712_v1, %v235_v45 }
  0xe7   :  { %v239_v48 = vrot.slane %v237_v46, 1  ;;  %v242_v49 = vadd.f32 %v237_v46, %v228_v44 }
  0xe9   :  { %v243_v50 = vadd.f32 %v239_v48, %v229_v47  ;;  %v432_v51 = vmul.f32 -1.442695, %v242_v49  ;;  %v306_v47 = vld [vmem:[#allocation8 + $0x6] sm:$0x1] }
  0xeb   :  { %479 = vpow2.f32 %v432_v51  ;;  %v433_v52 = vmul.f32 -1.442695, %v243_v50  ;;  %v307_v50 = vld [vmem:[#allocation8 + $0xe] sm:$0x1] }
  0xed   :  { %481 = vpow2.f32 %v433_v52 }
  0xf5   :  { %v480_v53 = vpop.eup %479 }
  0xf6   :  { %v250_v54 = vadd.f32 1.0, %v480_v53 }
  0xf7   :  { %v482_v55 = vpop.eup %481 }
  0xf8   :  { %483 = vrcp.f32 %v250_v54  ;;  %v251_v56 = vadd.f32 1.0, %v482_v55 }
  0xfa   :  { %485 = vrcp.f32 %v251_v56 }
 0x102   :  { %v484_v57 = vpop.eup %483 }
 0x103   :  { %v256_v59 = vsub.f32 1.0, %v484_v57  ;;  %v260_v63 = vmul.f32 %v484_v57, %v230_v58 }
 0x104   :  { %v486_v60 = vpop.eup %485 }
 0x105   :  { %v258_v62 = vmul.f32 %v256_v59, %v224_v39  ;;  %v257_v0 = vsub.f32 1.0, %v486_v60  ;;  %v261_v4 = vmul.f32 %v486_v60, %v231_v61  ;;  %v342_v59 = vld [vmem:[#allocation6 + $0x7] sm:$0x1] }
 0x107   :  { %v262_v2 = vadd.f32 %v260_v63, %v258_v62  ;;  %v259_v3 = vmul.f32 %v257_v0, %v225_v42  ;;  %v343_v62 = vld [vmem:[#allocation6 + $0xf] sm:$0x1] }
 0x109   :  { %264 = vst.msk [vmem:[#allocation9 + $0x4] sm:$0x1] %vm110_vm1, %v262_v2  ;;  %v263_v5 = vadd.f32 %v261_v4, %v259_v3 }
 0x10b   :  { %265 = vst.msk [vmem:[#allocation9 + $0xc] sm:$0x1] %vm110_vm1, %v263_v5  ;;  %v272_v6 = vrot.slane %v263_v5, 7 }
 0x10d   :  { %v273_v8 = vsel %vm120_vm2, %v272_v6, %v262_v2 }
 0x10e   :  { %v275_v9 = vmul.f32 %v712_v1, %v273_v8 }
 0x110   :  { %v277_v11 = vrot.slane %v275_v9, 1  ;;  %v280_v12 = vadd.f32 %v275_v9, %v266_v7 }
 0x112   :  { %v281_v13 = vadd.f32 %v277_v11, %v267_v10  ;;  %v434_v14 = vmul.f32 -1.442695, %v280_v12  ;;  %v344_v10 = vld [vmem:[#allocation8 + $0x7] sm:$0x1] }
 0x114   :  { %487 = vpow2.f32 %v434_v14  ;;  %v435_v15 = vmul.f32 -1.442695, %v281_v13  ;;  %v345_v13 = vld [vmem:[#allocation8 + $0xf] sm:$0x1] }
 0x116   :  { %489 = vpow2.f32 %v435_v15 }
 0x11e   :  { %v488_v16 = vpop.eup %487 }
 0x11f   :  { %v288_v17 = vadd.f32 1.0, %v488_v16 }
 0x120   :  { %v490_v18 = vpop.eup %489 }
 0x121   :  { %491 = vrcp.f32 %v288_v17  ;;  %v289_v19 = vadd.f32 1.0, %v490_v18 }
 0x123   :  { %493 = vrcp.f32 %v289_v19 }
 0x12b   :  { %v492_v20 = vpop.eup %491 }
 0x12c   :  { %v294_v22 = vsub.f32 1.0, %v492_v20  ;;  %v298_v26 = vmul.f32 %v492_v20, %v268_v21 }
 0x12d   :  { %v494_v23 = vpop.eup %493 }
 0x12e   :  { %v296_v25 = vmul.f32 %v294_v22, %v262_v2  ;;  %v295_v27 = vsub.f32 1.0, %v494_v23  ;;  %v299_v30 = vmul.f32 %v494_v23, %v269_v24 }
 0x130   :  { %v300_v28 = vadd.f32 %v298_v26, %v296_v25  ;;  %v297_v29 = vmul.f32 %v295_v27, %v263_v5 }
 0x132   :  { %302 = vst.msk [vmem:[#allocation9 + $0x5] sm:$0x1] %vm110_vm1, %v300_v28  ;;  %v301_v31 = vadd.f32 %v299_v30, %v297_v29 }
 0x134   :  { %303 = vst.msk [vmem:[#allocation9 + $0xd] sm:$0x1] %vm110_vm1, %v301_v31  ;;  %v310_v32 = vrot.slane %v301_v31, 7 }
 0x136   :  { %v311_v34 = vsel %vm120_vm2, %v310_v32, %v300_v28 }
 0x137   :  { %v313_v35 = vmul.f32 %v712_v1, %v311_v34 }
 0x139   :  { %v315_v37 = vrot.slane %v313_v35, 1  ;;  %v318_v38 = vadd.f32 %v313_v35, %v304_v33 }
 0x13b   :  { %v319_v39 = vadd.f32 %v315_v37, %v305_v36  ;;  %v436_v40 = vmul.f32 -1.442695, %v318_v38 }
 0x13d   :  { %495 = vpow2.f32 %v436_v40  ;;  %v437_v41 = vmul.f32 -1.442695, %v319_v39 }
 0x13f   :  { %497 = vpow2.f32 %v437_v41 }
 0x147   :  { %v496_v42 = vpop.eup %495 }
 0x148   :  { %v326_v43 = vadd.f32 1.0, %v496_v42 }
 0x149   :  { %v498_v44 = vpop.eup %497 }
 0x14a   :  { %499 = vrcp.f32 %v326_v43  ;;  %v327_v45 = vadd.f32 1.0, %v498_v44 }
 0x14c   :  { %501 = vrcp.f32 %v327_v45 }
 0x154   :  { %v500_v46 = vpop.eup %499 }
 0x155   :  { %v332_v48 = vsub.f32 1.0, %v500_v46  ;;  %v336_v52 = vmul.f32 %v500_v46, %v306_v47 }
 0x156   :  { %v502_v49 = vpop.eup %501 }
 0x157   :  { %v334_v51 = vmul.f32 %v332_v48, %v300_v28  ;;  %v333_v53 = vsub.f32 1.0, %v502_v49  ;;  %v337_v56 = vmul.f32 %v502_v49, %v307_v50 }
 0x159   :  { %v338_v54 = vadd.f32 %v336_v52, %v334_v51  ;;  %v335_v55 = vmul.f32 %v333_v53, %v301_v31 }
 0x15b   :  { %340 = vst.msk [vmem:[#allocation9 + $0x6] sm:$0x1] %vm110_vm1, %v338_v54  ;;  %v339_v57 = vadd.f32 %v337_v56, %v335_v55 }
 0x15d   :  { %341 = vst.msk [vmem:[#allocation9 + $0xe] sm:$0x1] %vm110_vm1, %v339_v57  ;;  %v348_v58 = vrot.slane %v339_v57, 7 }
 0x15f   :  { %v349_v60 = vsel %vm120_vm2, %v348_v58, %v338_v54 }
 0x160   :  { %v351_v61 = vmul.f32 %v712_v1, %v349_v60 }
 0x162   :  { %v353_v63 = vrot.slane %v351_v61, 1  ;;  %v356_v0 = vadd.f32 %v351_v61, %v342_v59 }
 0x164   :  { %v357_v2 = vadd.f32 %v353_v63, %v343_v62  ;;  %v438_v3 = vmul.f32 -1.442695, %v356_v0 }
 0x166   :  { %503 = vpow2.f32 %v438_v3  ;;  %v439_v4 = vmul.f32 -1.442695, %v357_v2 }
 0x168   :  { %505 = vpow2.f32 %v439_v4 }
 0x170   :  { %v504_v5 = vpop.eup %503 }
 0x171   :  { %v364_v6 = vadd.f32 1.0, %v504_v5 }
 0x172   :  { %v506_v7 = vpop.eup %505 }
 0x173   :  { %507 = vrcp.f32 %v364_v6  ;;  %v365_v8 = vadd.f32 1.0, %v506_v7 }
 0x175   :  { %509 = vrcp.f32 %v365_v8 }
 0x17d   :  { %v508_v9 = vpop.eup %507 }
 0x17e   :  { %v370_v11 = vsub.f32 1.0, %v508_v9  ;;  %v374_v14 = vmul.f32 %v508_v9, %v344_v10 }
 0x17f   :  { %v510_v12 = vpop.eup %509 }
 0x180   :  { %v372_v1 = vmul.f32 %v370_v11, %v338_v54  ;;  %v371_v15 = vsub.f32 1.0, %v510_v12  ;;  %v375_v18 = vmul.f32 %v510_v12, %v345_v13 }
 0x182   :  { %v376_v16 = vadd.f32 %v374_v14, %v372_v1  ;;  %v373_v17 = vmul.f32 %v371_v15, %v339_v57 }
 0x184   :  { %378 = vst.msk [vmem:[#allocation9 + $0x7] sm:$0x1] %vm110_vm1, %v376_v16  ;;  %v377_v19 = vadd.f32 %v375_v18, %v373_v17 }
 0x186   :  { %379 = vst.msk [vmem:[#allocation9 + $0xf] sm:$0x1] %vm110_vm1, %v377_v19  ;;  %v382_v20 = vrot.slane %v377_v19, 7 }
 0x187   :  { %588 = shalt.err (!%p585_p0)
}
 0x188   :  { %s589_s14 = scalar_lea.hbm %s786_s4, 256 }
 0x189   :  { %p590_p1 = scmp.ne.s32.totalorder %s786_s4, %s589_s14  ;;  %p593_p2 = scmp.lt.u32.totalorder %s589_s14, %s786_s4 }
 0x18b   :  { %p595_p3 = pnand %p593_p2, %p590_p1 }
 0x18d   :  { %598 = shalt.err (!%p595_p3)
}
 0x18e   :  { %402 = dma.vmem_to_hbm [thread:$0]  %s397_s3, 256, %s786_s4, [#allocation5], %s630_s28, %s630_s28, %s631_s29   ;;  %v383_v21 = vsel %vm120_vm2, %v382_v20, %v376_v16 }
 0x18f   :  { %386 = vst.msk [vmem:[#allocation2] sm:$0x3] %vm65_vm0, %v383_v21  ;;  %390 = vst.msk [vmem:[#allocation10] sm:$0x3] %vm65_vm0, %v383_v21  ;;  %s599_s20 = scalar_lea.vmem %s745_s10, 32  ;;  %p604_p5 = scmp.lt.s32.totalorder %s745_s10, %s745_s10 }
 0x190   :  { %p600_p4 = scmp.ne.s32.totalorder %s745_s10, %s599_s20  ;;  %p605_p6 = scmp.lt.s32.totalorder %s599_s20, %s599_s20 }
 0x192   :  { %p606_p7 = por %p605_p6, %p604_p5 }
 0x194   :  { %p607_p8 = pnand %p606_p7, %p600_p4 }
 0x196   :  { %610 = shalt.err (!%p607_p8)
}
 0x197   :  { %s611_s23 = scalar_lea.hbm %s787_s5, 32 }
 0x198   :  { %p612_p9 = scmp.ne.s32.totalorder %s787_s5, %s611_s23  ;;  %p615_p10 = scmp.lt.u32.totalorder %s611_s23, %s787_s5 }
 0x19a   :  { %p617_p11 = pnand %p615_p10, %p612_p9 }
 0x19c   :  { %620 = shalt.err (!%p617_p11)
}
 0x19d   :  { %412 = dma.vmem_to_hbm [thread:$0]  %s745_s10, 32, %s787_s5, [#allocation11]  }
 0x19e   :  { %625 = dma.done.wait [#allocation5], 256  }
 0x19f   :  { %626 = vsyncadd [#allocation5], 4294967040 }
 0x1a0   :  { %627 = dma.done.wait [#allocation11], 32  }
 0x1a1   :  { %628 = vsyncadd [#allocation11], 4294967264 }
 0x1a2   :  { %419 = vsyncpa [#allocation4], 1 }
 0x1a3   :  { %420 = vsyncpa [#allocation7], 1 }
 0x1a4   :  { %421 = vsyncpa [#allocation5], 1 }
 0x1a5   :  { %422 = vsyncpa [#allocation11], 1 }

</bundles_post_ra>
